<compile_context>
chip_gen: v6e
topology: v6e:2x2x1
jax: 0.10.0
libtpu: 0.0.40
codegen_flags: <defaults>
</compile_context>

<pallas_src>
import jax
import jax.numpy as jnp
from jax.experimental import pallas as pl
from jax.experimental.pallas import tpu as pltpu

_EPS = 1e-12   # ATen cosine_embedding_loss adds eps to the *squared* norms
_LANE = 128


def _round_up(x, m):
    return ((x + m - 1) // m) * m


def _largest_aligned_divisor(n, align, upper):
    """Largest d with d | n, d % align == 0, d <= upper (or None if none exists)."""
    best = None
    upper = min(n, upper)
    d = align
    while d <= upper:
        if n % d == 0:
            best = d
        d += align
    return best


def _vmem_capacity_bytes():
    try:
        return int(pltpu.get_tpu_info().vmem_capacity_bytes)
    except Exception:
        return 64 * 1024 * 1024  # conservative fallback: assume v7x-sized VMEM


def _partial_sums_kernel(s_ref, t_ref, st_ref, ss_ref, tt_ref):
    """Accumulate lane-dense per-row partials of <s,t>, ||s||^2, ||t||^2 over D."""
    k = pl.program_id(1)

    @pl.when(k == 0)
    def _():
        st_ref[...] = jnp.zeros_like(st_ref)
        ss_ref[...] = jnp.zeros_like(ss_ref)
        tt_ref[...] = jnp.zeros_like(tt_ref)

    n_chunks = s_ref.shape[1] // _LANE

    st = st_ref[...]
    ss = ss_ref[...]
    tt = tt_ref[...]
    # Static, 128-aligned lane chunks: pure VPU multiply-adds into the wide
    # accumulators; no cross-lane XLU work and no masked stores per grid step.
    for c in range(n_chunks):
        sl = slice(c * _LANE, (c + 1) * _LANE)
        s = s_ref[:, sl].astype(jnp.float32)
        t = t_ref[:, sl].astype(jnp.float32)
        st = st + s * t
        ss = ss + s * s
        tt = tt + t * t
    st_ref[...] = st
    ss_ref[...] = ss
    tt_ref[...] = tt


def cosine_similarity_loss(feat_s, feat_t):
    # Glue: flatten like torch.flatten(x, start_dim=1)
    if feat_s.ndim > 2:
        feat_s = feat_s.reshape(feat_s.shape[0], -1)
        feat_t = feat_t.reshape(feat_t.shape[0], -1)
    B, D = feat_s.shape
    assert feat_t.shape == (B, D)

    itemsize = jnp.dtype(feat_s.dtype).itemsize
    # Packed-sublane multiple of the streamed dtype: 8 (f32) / 16 (bf16) / 32 (int8).
    sub_mult = max(8, 32 // max(1, itemsize))

    # --- small-batch sublane packing: (B, D) -> (B*fold, D//fold) -----------------
    # Only fold when D//fold stays a multiple of 128, so packing never forces a pad.
    fold = 1
    if B < sub_mult:
        for f in ((16, 8, 4, 2) if itemsize <= 2 else (8, 4, 2)):
            if D % (f * _LANE) == 0:
                fold = f
                break
    if fold > 1:
        feat_s = feat_s.reshape(B * fold, D // fold)
        feat_t = feat_t.reshape(B * fold, D // fold)
    Br, Dr = feat_s.shape

    # --- generation-aware block / VMEM budgets -------------------------------------
    vmem_cap = _vmem_capacity_bytes()
    if vmem_cap >= 96 * 1024 * 1024:          # v5e / v6e: 128 MiB physical VMEM
        max_block_bytes = 8 * 1024 * 1024
        vmem_limit_cap = 100 * 1024 * 1024
    else:                                      # v7x: 64 MiB physical VMEM
        max_block_bytes = 4 * 1024 * 1024
        vmem_limit_cap = 56 * 1024 * 1024

    # --- lane (D) tiling: big multiple-of-128 tile that DIVIDES D (no pad) ----------
    target_td = 2048 if itemsize <= 2 else 1024
    Dp = _round_up(Dr, _LANE)                  # minimal pad only if D ragged vs 128
    tile_d = _largest_aligned_divisor(Dp, _LANE, target_td)   # always >= 128
    if Dp // tile_d > 8 and tile_d < target_td // 4:
        # Pathological divisor structure: accept a pad to keep tiles big.
        tile_d = min(target_td, Dp)
        Dp = _round_up(Dp, tile_d)

    # --- sublane (B) tiling ---------------------------------------------------------
    tile_b_budget = max(
        sub_mult, (max_block_bytes // (tile_d * itemsize)) // sub_mult * sub_mult)
    Bp = Br
    if Br > tile_b_budget:
        tb = _largest_aligned_divisor(Br, sub_mult, tile_b_budget)
        if tb is not None:
            tile_b = tb                         # divides Br: no pad
        else:
            tile_b = tile_b_budget              # last resort: pad B
            Bp = _round_up(Br, tile_b)
    else:
        # Whole (folded) batch fits in one block: still try to split into >=2
        # parallel blocks (without padding) so both v7x TensorCores stream HBM.
        tb = None
        if Br >= 2 * sub_mult:
            tb = _largest_aligned_divisor(Br, sub_mult, Br // 2)
        tile_b = tb if tb is not None else Br

    # --- last-resort zero padding (neutral for the three sums) ----------------------
    # TODO(synk): replace the rare ragged-D pad with in-kernel masking of the last tile.
    if (Bp, Dp) != (Br, Dr):
        pad = ((0, Bp - Br), (0, Dp - Dr))
        feat_s = jnp.pad(feat_s, pad)
        feat_t = jnp.pad(feat_t, pad)

    grid = (Bp // tile_b, Dp // tile_d)

    block_bytes = tile_b * tile_d * itemsize
    acc_bytes = 3 * tile_b * _LANE * 4
    vmem_limit = max(32 * 1024 * 1024,
                     4 * block_bytes + 2 * acc_bytes + 2 * 1024 * 1024)
    vmem_limit = int(min(vmem_limit, vmem_limit_cap))

    cost = pl.CostEstimate(
        flops=int(8 * Bp * Dp),
        transcendentals=0,
        bytes_accessed=int(2 * Bp * Dp * itemsize + 3 * Bp * _LANE * 4),
    )

    st, ss, tt = pl.pallas_call(
        _partial_sums_kernel,
        out_shape=[
            jax.ShapeDtypeStruct((Bp, _LANE), jnp.float32),
            jax.ShapeDtypeStruct((Bp, _LANE), jnp.float32),
            jax.ShapeDtypeStruct((Bp, _LANE), jnp.float32),
        ],
        grid_spec=pltpu.PrefetchScalarGridSpec(
            num_scalar_prefetch=0,
            grid=grid,
            in_specs=[
                pl.BlockSpec((tile_b, tile_d), lambda i, k: (i, k)),
                pl.BlockSpec((tile_b, tile_d), lambda i, k: (i, k)),
            ],
            out_specs=[
                pl.BlockSpec((tile_b, _LANE), lambda i, k: (i, 0)),
                pl.BlockSpec((tile_b, _LANE), lambda i, k: (i, 0)),
                pl.BlockSpec((tile_b, _LANE), lambda i, k: (i, 0)),
            ],
        ),
        compiler_params=pltpu.CompilerParams(
            dimension_semantics=("parallel", "arbitrary"),
            vmem_limit_bytes=vmem_limit,
        ),
        cost_estimate=cost,
    )(feat_s, feat_t)

    # --- tiny epilogue in plain JAX (one 128->1 reduce per row, then cos/mean) ------
    st = jnp.sum(st[:Br], axis=1)
    ss = jnp.sum(ss[:Br], axis=1)
    tt = jnp.sum(tt[:Br], axis=1)
    if fold > 1:
        st = st.reshape(B, fold).sum(axis=1)
        ss = ss.reshape(B, fold).sum(axis=1)
        tt = tt.reshape(B, fold).sum(axis=1)
    cos = st / jnp.sqrt((ss + _EPS) * (tt + _EPS))
    return jnp.mean(1.0 - cos)


def _reference(feat_s, feat_t):
    s = feat_s.reshape(feat_s.shape[0], -1).astype(jnp.float32)
    t = feat_t.reshape(feat_t.shape[0], -1).astype(jnp.float32)
    st = jnp.sum(s * t, axis=1)
    ss = jnp.sum(s * s, axis=1) + _EPS
    tt = jnp.sum(t * t, axis=1) + _EPS
    cos = st / jnp.sqrt(ss * tt)
    return jnp.mean(1.0 - cos)


if __name__ == "__main__":
    key = jax.random.PRNGKey(0)
    k1, k2 = jax.random.split(key)
    # Small NCHW-like feature maps: batch=2, channels=4, spatial=16x16.
    feat_s = jax.random.normal(k1, (2, 4, 16, 16), dtype=jnp.float32)
    feat_t = jax.random.normal(k2, (2, 4, 16, 16), dtype=jnp.float32)

    loss = cosine_similarity_loss(feat_s, feat_t)
    jax.block_until_ready(loss)

    ref = _reference(feat_s, feat_t)
    assert jnp.allclose(loss, ref, atol=1e-5, rtol=1e-5), (loss, ref)
    print("KERNEL_OK")
</pallas_src>

<mosaic_0001>
module attributes {stable_mosaic.version = 11 : i64} {
  func.func @_partial_sums_kernel(%arg0: i32, %arg1: i32, %arg2: memref<8x128xf32, #tpu.memory_space<vmem>>, %arg3: memref<8x128xf32, #tpu.memory_space<vmem>>, %arg4: memref<8x128xf32, #tpu.memory_space<vmem>>, %arg5: memref<8x128xf32, #tpu.memory_space<vmem>>, %arg6: memref<8x128xf32, #tpu.memory_space<vmem>>) attributes {dimension_semantics = [#tpu.dimension_semantics<parallel>, #tpu.dimension_semantics<arbitrary>], iteration_bounds = array<i64: 2, 1>, scalar_prefetch = 0 : i64, scratch_operands = 0 : i64, tpu.core_type = #tpu.core_type<tc>, window_params = [{transform_indices = @transform_0, window_bounds = array<i64: 8, 128>}, {transform_indices = @transform_1, window_bounds = array<i64: 8, 128>}, {transform_indices = @transform_2, window_bounds = array<i64: 8, 128>}, {transform_indices = @transform_3, window_bounds = array<i64: 8, 128>}, {transform_indices = @transform_4, window_bounds = array<i64: 8, 128>}]} {
    %c0_i32 = arith.constant 0 : i32
    %0 = arith.cmpi eq, %arg1, %c0_i32 : i32
    %1 = arith.extui %0 : i1 to i32
    %c0_i32_0 = arith.constant 0 : i32
    %2 = arith.cmpi ne, %1, %c0_i32_0 : i32
    scf.if %2 {
      %cst = arith.constant 0.000000e+00 : f32
      %17 = vector.broadcast %cst : f32 to vector<8x128xf32>
      %c0_16 = arith.constant 0 : index
      %c0_17 = arith.constant 0 : index
      %18 = vector.load %arg4[%c0_16, %c0_17] : memref<8x128xf32, #tpu.memory_space<vmem>>, vector<8x128xf32>
      tpu.vector_store %arg4[%c0_16, %c0_17], %17 {strides = array<i32>} : memref<8x128xf32, #tpu.memory_space<vmem>>, vector<8x128xf32>,
      %cst_18 = arith.constant 0.000000e+00 : f32
      %19 = vector.broadcast %cst_18 : f32 to vector<8x128xf32>
      %c0_19 = arith.constant 0 : index
      %c0_20 = arith.constant 0 : index
      %20 = vector.load %arg5[%c0_19, %c0_20] : memref<8x128xf32, #tpu.memory_space<vmem>>, vector<8x128xf32>
      tpu.vector_store %arg5[%c0_19, %c0_20], %19 {strides = array<i32>} : memref<8x128xf32, #tpu.memory_space<vmem>>, vector<8x128xf32>,
      %cst_21 = arith.constant 0.000000e+00 : f32
      %21 = vector.broadcast %cst_21 : f32 to vector<8x128xf32>
      %c0_22 = arith.constant 0 : index
      %c0_23 = arith.constant 0 : index
      %22 = vector.load %arg6[%c0_22, %c0_23] : memref<8x128xf32, #tpu.memory_space<vmem>>, vector<8x128xf32>
      tpu.vector_store %arg6[%c0_22, %c0_23], %21 {strides = array<i32>} : memref<8x128xf32, #tpu.memory_space<vmem>>, vector<8x128xf32>,
    } else {
    }
    %c0 = arith.constant 0 : index
    %c0_1 = arith.constant 0 : index
    %3 = vector.load %arg4[%c0, %c0_1] : memref<8x128xf32, #tpu.memory_space<vmem>>, vector<8x128xf32>
    %c0_2 = arith.constant 0 : index
    %c0_3 = arith.constant 0 : index
    %4 = vector.load %arg5[%c0_2, %c0_3] : memref<8x128xf32, #tpu.memory_space<vmem>>, vector<8x128xf32>
    %c0_4 = arith.constant 0 : index
    %c0_5 = arith.constant 0 : index
    %5 = vector.load %arg6[%c0_4, %c0_5] : memref<8x128xf32, #tpu.memory_space<vmem>>, vector<8x128xf32>
    %c0_6 = arith.constant 0 : index
    %c0_7 = arith.constant 0 : index
    %6 = vector.load %arg2[%c0_6, %c0_7] : memref<8x128xf32, #tpu.memory_space<vmem>>, vector<8x128xf32>
    %c0_8 = arith.constant 0 : index
    %c0_9 = arith.constant 0 : index
    %7 = vector.load %arg3[%c0_8, %c0_9] : memref<8x128xf32, #tpu.memory_space<vmem>>, vector<8x128xf32>
    %8 = arith.mulf %6, %7 : vector<8x128xf32>
    %9 = arith.addf %3, %8 : vector<8x128xf32>
    %10 = arith.mulf %6, %6 : vector<8x128xf32>
    %11 = arith.addf %4, %10 : vector<8x128xf32>
    %12 = arith.mulf %7, %7 : vector<8x128xf32>
    %13 = arith.addf %5, %12 : vector<8x128xf32>
    %c0_10 = arith.constant 0 : index
    %c0_11 = arith.constant 0 : index
    %14 = vector.load %arg4[%c0_10, %c0_11] : memref<8x128xf32, #tpu.memory_space<vmem>>, vector<8x128xf32>
    tpu.vector_store %arg4[%c0_10, %c0_11], %9 {strides = array<i32>} : memref<8x128xf32, #tpu.memory_space<vmem>>, vector<8x128xf32>,
    %c0_12 = arith.constant 0 : index
    %c0_13 = arith.constant 0 : index
    %15 = vector.load %arg5[%c0_12, %c0_13] : memref<8x128xf32, #tpu.memory_space<vmem>>, vector<8x128xf32>
    tpu.vector_store %arg5[%c0_12, %c0_13], %11 {strides = array<i32>} : memref<8x128xf32, #tpu.memory_space<vmem>>, vector<8x128xf32>,
    %c0_14 = arith.constant 0 : index
    %c0_15 = arith.constant 0 : index
    %16 = vector.load %arg6[%c0_14, %c0_15] : memref<8x128xf32, #tpu.memory_space<vmem>>, vector<8x128xf32>
    tpu.vector_store %arg6[%c0_14, %c0_15], %13 {strides = array<i32>} : memref<8x128xf32, #tpu.memory_space<vmem>>, vector<8x128xf32>,
    return
  }
  func.func @transform_0(%arg0: i32, %arg1: i32) -> (i32, i32) {
    %c0_i32 = arith.constant 0 : i32
    return %arg0, %arg1 : i32, i32
  }
  func.func @transform_1(%arg0: i32, %arg1: i32) -> (i32, i32) {
    %c0_i32 = arith.constant 0 : i32
    return %arg0, %arg1 : i32, i32
  }
  func.func @transform_2(%arg0: i32, %arg1: i32) -> (i32, i32) {
    %c0_i32 = arith.constant 0 : i32
    %c0_i32_0 = arith.constant 0 : i32
    return %arg0, %c0_i32 : i32, i32
  }
  func.func @transform_3(%arg0: i32, %arg1: i32) -> (i32, i32) {
    %c0_i32 = arith.constant 0 : i32
    %c0_i32_0 = arith.constant 0 : i32
    return %arg0, %c0_i32 : i32, i32
  }
  func.func @transform_4(%arg0: i32, %arg1: i32) -> (i32, i32) {
    %c0_i32 = arith.constant 0 : i32
    %c0_i32_0 = arith.constant 0 : i32
    return %arg0, %c0_i32 : i32, i32
  }
}

</mosaic_0001>

<bundles_post_ra>
// kernel: tpu_custom_call.1
= control target key start
LH: loop header
LB: loop body
LE: loop exit
PB: predicated region body
PF: predicated region fallthrough
CT: control target
= control target key end

     0   :  { %s1096_s0 = inlined_call_operand.hbm [shape: f32[16,128], index: 0, kind: input, shape index: {}]   ;;  %s1097_s1 = inlined_call_operand.hbm [shape: f32[16,128], index: 1, kind: input, shape index: {}]   ;;  %s1098_s2 = inlined_call_operand.hbm [shape: f32[16,128], index: 2, kind: output, shape index: {0}]   ;;  %s1099_s3 = inlined_call_operand.hbm [shape: f32[16,128], index: 3, kind: output, shape index: {1}]   ;;  %s1100_s4 = inlined_call_operand.hbm [shape: f32[16,128], index: 4, kind: output, shape index: {2}]  }
   0x1   :  { %1102 = sst [smem:[#allocation15_spill]] %s1096_s0 }
   0x2   :  { %1103 = sst [smem:[#allocation16_spill]] %s1097_s1 }
   0x3   :  { %10 = vsyncpa [#allocation3], 0 }
   0x4   :  { %12 = vsyncpa [#allocation3 + $0x1], 0 }
   0x5   :  { %13 = vsyncpa [#allocation6], 0 }
   0x6   :  { %15 = vsyncpa [#allocation6 + $0x1], 0 }
   0x7   :  { %16 = vsyncpa [#allocation4], 0 }
   0x8   :  { %18 = vsyncpa [#allocation4 + $0x1], 0 }
   0x9   :  { %19 = vsyncpa [#allocation9], 0 }
   0xa   :  { %21 = vsyncpa [#allocation9 + $0x1], 0  ;;  %s849_s15 = smov 0   ;;  %s851_s16 = smov 0  }
   0xb   :  { %s853_s17 = smov 0   ;;  %s855_s18 = smov 0  }
   0xc   :  { %s857_s19 = smov 0   ;;  %s859_s20 = smov 0  }
   0xd LB: > { %s880_s21 = sadd.s32 4294967295, %s817_s20   ;;  %s1101_s22 = sadd.s32 4294967294, %s817_s20   ;;  %s817_s20 = sphi %s859_s20, %s27_s20   ;;  %s813_s19 = sphi %s857_s19, %s1118_s19   ;;  %s809_s18 = sphi %s855_s18, %s1117_s18   ;;  %s805_s17 = sphi %s853_s17, %s1116_s17   ;;  %s801_s16 = sphi %s851_s16, %s1115_s16   ;;  %s797_s15 = sphi %s849_s15, %s1114_s15  }
   0xe   : > { %s39_s23 = sadd.s32 1, %s813_s19  ;;  %s48_s24 = sadd.s32 1, %s805_s17 }
   0xf   : > { %p41_p0 = scmp.ge.s32.totalorder %s39_s23, 2  ;;  %p55_p1 = scmp.ne.s32.totalorder %s805_s17, %s801_s16 }
  0x10   : > { %p56_p2 = scmp.eq.s32.totalorder %s817_s20, 0  ;;  %p61_p3 = scmp.ne.s32.totalorder %s801_s16, %s797_s15 }
  0x11   : > { %s1120_s23 = smov (%p41_p0, %s39_s23), 0  ;;  %p62_p5 = scmp.eq.s32.totalorder %s880_s21, 0 }
  0x12   : > { %p892_p4 = por %p56_p2, %p55_p1  ;;  %s43_s26 = ssub.s32 %s813_s19, %s1120_s23 }
  0x13   : > { %p113_p6 = scmp.eq.s32.totalorder %s880_s21, 1  ;;  %p46_p7 = scmp.eq.s32.totalorder %s43_s26, 0 }
  0x14   : > { %p900_p8 = por %p62_p5, %p61_p3  ;;  %p119_p10 = scmp.eq.s32.totalorder %s1101_s22, 1 }
  0x15   : > { %p904_p9 = por %p113_p6, %p55_p1  ;;  %p570_p13 = scmp.lt.s32.totalorder %s817_s20, 2 }
  0x16   : > { %s911_s29 = scalar_select %p46_p7, %s805_s17, %s48_s24  }
  0x17   : > { %p913_p11 = por %p119_p10, %p61_p3  ;;  %s920_s5 = sand.u32 1, %s805_s17  }
  0x18   : > { %s525_s6 = sshll.u32 %s920_s5, 3  ;;  %s526_s7 = sshll.u32 %s813_s19, 7 }
  0x19   : > { %s1108_s0 = sld [smem:[#allocation15_spill]]  ;;  %s195_s11 = scalar_lea.vmem [#allocation2], %s525_s6 }
  0x1a   : > { %s203_s12 = sshll.u32 %s195_s11, 4  ;;  %p929_p0 = pnand %p570_p13, %p892_p4  ;;  %s204_s12 = int_to_ptr.vmem [resolvable:$true] %s203_s12 }
  0x1b   : > { %p529_p1 = scmp.ge.s32.totalorder %s817_s20, 1  ;;  %p227_p2 = scmp.lt.s32.totalorder %s817_s20, 3 }
  0x1c   : > { %s192_s14 = scalar_lea.sflag [#allocation3], %s920_s5  ;;  %p623_p3 = pneg %p929_p0 }
  0x1d   : > { %s634_s24 = scalar_lea.vmem %s204_s12, 128  ;;  %s819_s26 = smov [#allocation2]  }
  0x1e   : > { %p635_p5 = scmp.ne.s32.totalorder %s204_s12, %s634_s24  ;;  %s639_s8 = sshll.u32 %s819_s26, 4  ;;  %s640_s8 = int_to_ptr.vmem [resolvable:$false] %s639_s8 }
  0x1f   : > { %s201_s10 = scalar_lea.hbm %s1108_s0, %s526_s7  ;;  %s641_s25 = scalar_lea.vmem %s640_s8, 256 }
  0x20   : > { %p637_p6 = pnand %p635_p5, %p623_p3  ;;  %p642_p4 = scmp.lt.s32.totalorder %s204_s12, %s640_s8 }
  0x21   : > { %p643_p10 = scmp.lt.s32.totalorder %s641_s25, %s634_s24 }
  0x22   : > { %p638_p7 = pneg %p637_p6 }
  0x23   : > { %p644_p13 = por %p643_p10, %p642_p4 }
  0x25   : > { %p645_p12 = pnand %p644_p13, %p638_p7 }
  0x27   : > { %648 = shalt.err (!%p645_p12)
}
  0x28   : > { %556 = dma.hbm_to_vmem [thread:$0]  (!%p929_p0), %s201_s10, 128, %s204_s12, %s192_s14  }
  0x29   : > { %p947_p5 = pnand %p529_p1, %p227_p2  ;;  %s1111_s1 = sld [smem:[#allocation16_spill]] }
  0x2a   : > { %s214_s8 = scalar_lea.vmem [#allocation5], %s525_s6  ;;  %s211_s22 = scalar_lea.sflag [#allocation6], %s920_s5 }
  0x2b   : > { %s222_s25 = sshll.u32 %s214_s8, 4  ;;  %s820_s10 = smov [#allocation5]   ;;  %s223_s25 = int_to_ptr.vmem [resolvable:$true] %s222_s25 }
  0x2c   : > { %s662_s0 = scalar_lea.vmem %s223_s25, 128  ;;  %s667_s12 = sshll.u32 %s820_s10, 4  ;;  %s668_s12 = int_to_ptr.vmem [resolvable:$false] %s667_s12 }
  0x2d   : > { %p663_p12 = scmp.ne.s32.totalorder %s223_s25, %s662_s0  ;;  %s669_s14 = scalar_lea.vmem %s668_s12, 256 }
  0x2e   : > { %p670_p1 = scmp.lt.s32.totalorder %s223_s25, %s668_s12  ;;  %p671_p2 = scmp.lt.s32.totalorder %s669_s14, %s662_s0 }
  0x2f   : > { %s220_s24 = scalar_lea.hbm %s1111_s1, %s526_s7  ;;  %p665_p6 = pnand %p663_p12, %p623_p3 }
  0x30   : > { %p672_p4 = por %p671_p2, %p670_p1 }
  0x31   : > { %p666_p7 = pneg %p665_p6 }
  0x33   : > { %p673_p10 = pnand %p672_p4, %p666_p7 }
  0x35   : > { %676 = shalt.err (!%p673_p10)
}
  0x36   : > { %559 = dma.hbm_to_vmem [thread:$0]  (!%p929_p0), %s220_s24, 128, %s223_s25, %s211_s22  }
  0x37   : > { %231 = sbr.rel (%p947_p5) target bundleno = 133 (0x85), region = 28  ;;  %s963_s5 = sand.u32 (!%p947_p5), 1, %s801_s16  }
  0x38   : > { %s966_s6 = sshll.u32 (!%p947_p5), %s963_s5, 3  ;;  %s234_s7 = scalar_lea.sflag (!%p947_p5), [#allocation3], %s963_s5 }
  0x39   : > { %s237_s0 = scalar_lea.vmem (!%p947_p5), [#allocation2], %s966_s6 }
  0x3c   : > { %780 = dma.done.wait (%p900_p8), %s234_s7, 128  }
  0x3d   : > { %782 = vsyncadd (%p900_p8), %s234_s7, 4294967168  ;;  %s243_s22 = scalar_lea.sflag [#allocation6], %s963_s5  ;;  %s246_s13 = scalar_lea.vmem [#allocation5], %s966_s6 }
  0x3e   : > { %784 = dma.done.wait (%p900_p8), %s243_s22, 128  }
  0x3f   : > { %786 = vsyncadd (%p900_p8), %s243_s22, 4294967168  ;;  %s312_s9 = sand.u32 1, %s880_s21   ;;  %s538_s11 = sshll.u32 %s809_s18, 7  ;;  %v296_v0 = vld [vmem:[%s237_s0] sm:$0xff]  ;;  %v297_v1 = vld [vmem:[%s246_s13] sm:$0xff] }
  0x40   : > { %s278_s26 = scalar_lea.vmem [#allocation8], %s966_s6  ;;  %s285_s8 = scalar_lea.vmem [#allocation10], %s966_s6  ;;  %v300_v2 = vmul.f32 %v296_v0, %v296_v0  ;;  %v298_v3 = vmul.f32 %v297_v1, %v296_v0  ;;  %v302_v4 = vmul.f32 %v297_v1, %v297_v1 }
  0x41   : > { %s344_s24 = sshll.u32 %s278_s26, 4  ;;  %s357_s25 = sshll.u32 %s285_s8, 4  ;;  %s990_s24 = int_to_ptr.vmem [resolvable:$true] %s344_s24  ;;  %s999_s25 = int_to_ptr.vmem [resolvable:$true] %s357_s25 }
  0x42   : > { %s271_s10 = scalar_lea.vmem [#allocation7], %s966_s6  ;;  %s988_s7 = scalar_lea.hbm %s1099_s3, %s538_s11  ;;  %305 = vst [vmem:[%s278_s26] sm:$0xff] %v300_v2  ;;  %306 = vst [vmem:[%s285_s8] sm:$0xff] %v302_v4 }
  0x43   : > { %s331_s27 = sshll.u32 %s271_s10, 4  ;;  %s995_s0 = scalar_lea.hbm %s1098_s2, %s538_s11  ;;  %304 = vst [vmem:[%s271_s10] sm:$0xff] %v298_v3  ;;  %s997_s27 = int_to_ptr.vmem [resolvable:$true] %s331_s27 }
  0x44   : > { %s1004_s13 = scalar_lea.hbm %s1100_s4, %s538_s11  ;;  %s1006_s12 = scalar_lea.sflag [#allocation9], %s312_s9 }
  0x45   : > { %s677_s14 = scalar_lea.vmem %s990_s24, 128  ;;  %s821_s18 = smov [#allocation8]  }
  0x46   : > { %p678_p8 = scmp.ne.s32.totalorder %s990_s24, %s677_s14  ;;  %s681_s21 = sshll.u32 %s821_s18, 4  ;;  %s682_s21 = int_to_ptr.vmem [resolvable:$false] %s681_s21 }
  0x47   : > { %s683_s1 = scalar_lea.vmem %s682_s21, 256  ;;  %p684_p13 = scmp.lt.s32.totalorder %s990_s24, %s682_s21 }
  0x48   : > { %p679_p0 = pnand %p678_p8, %p904_p9  ;;  %p685_p5 = scmp.lt.s32.totalorder %s683_s1, %s677_s14 }
  0x4a   : > { %p680_p3 = pneg %p679_p0  ;;  %p686_p12 = por %p685_p5, %p684_p13 }
  0x4c   : > { %p687_p6 = pnand %p686_p12, %p680_p3 }
  0x4e   : > { %690 = shalt.err (!%p687_p6)
}
  0x4f   : > { %s691_s9 = scalar_lea.hbm %s988_s7, 128  ;;  %s695_s8 = scalar_lea.hbm %s1099_s3, 256 }
  0x50   : > { %p692_p7 = scmp.ne.s32.totalorder %s988_s7, %s691_s9  ;;  %p696_p4 = scmp.lt.s32.totalorder %s988_s7, %s1099_s3 }
  0x51   : > { %p697_p10 = scmp.lt.s32.totalorder %s695_s8, %s691_s9 }
  0x52   : > { %p693_p1 = pnand %p692_p7, %p904_p9 }
  0x53   : > { %p698_p8 = por %p697_p10, %p696_p4 }
  0x54   : > { %p694_p2 = pneg %p693_p1 }
  0x56   : > { %p699_p0 = pnand %p698_p8, %p694_p2 }
  0x58   : > { %702 = shalt.err (!%p699_p0)
}
  0x59   : > { %548 = dma.vmem_to_hbm [thread:$0]  (%p904_p9), %s990_s24, 128, %s988_s7, %s1006_s12  }
  0x5a   : > { %s308_s1 = scalar_lea.sflag [#allocation4], %s963_s5  ;;  %s703_s22 = scalar_lea.vmem %s997_s27, 128 }
  0x5b   : > { %p704_p3 = scmp.ne.s32.totalorder %s997_s27, %s703_s22  ;;  %s822_s14 = smov [#allocation7]  }
  0x5c   : > { %s707_s18 = sshll.u32 %s822_s14, 4  ;;  %s708_s18 = int_to_ptr.vmem [resolvable:$false] %s707_s18 }
  0x5d   : > { %p705_p13 = pnand %p704_p3, %p904_p9  ;;  %s709_s21 = scalar_lea.vmem %s708_s18, 256 }
  0x5e   : > { %p710_p12 = scmp.lt.s32.totalorder %s997_s27, %s708_s18  ;;  %p711_p6 = scmp.lt.s32.totalorder %s709_s21, %s703_s22 }
  0x5f   : > { %p706_p5 = pneg %p705_p13 }
  0x60   : > { %p712_p7 = por %p711_p6, %p710_p12 }
  0x62   : > { %p713_p1 = pnand %p712_p7, %p706_p5 }
  0x64   : > { %716 = shalt.err (!%p713_p1)
}
  0x65   : > { %s717_s24 = scalar_lea.hbm %s995_s0, 128  ;;  %s721_s9 = scalar_lea.hbm %s1098_s2, 256 }
  0x66   : > { %p718_p2 = scmp.ne.s32.totalorder %s995_s0, %s717_s24  ;;  %p722_p8 = scmp.lt.s32.totalorder %s995_s0, %s1098_s2 }
  0x67   : > { %p723_p0 = scmp.lt.s32.totalorder %s721_s9, %s717_s24 }
  0x68   : > { %p719_p4 = pnand %p718_p2, %p904_p9 }
  0x69   : > { %p724_p3 = por %p723_p0, %p722_p8 }
  0x6a   : > { %p720_p10 = pneg %p719_p4 }
  0x6c   : > { %p725_p13 = pnand %p724_p3, %p720_p10 }
  0x6e   : > { %728 = shalt.err (!%p725_p13)
}
  0x6f   : > { %547 = dma.vmem_to_hbm [thread:$0]  (%p904_p9), %s997_s27, 128, %s995_s0, %s308_s1  }
  0x70   : > { %s729_s8 = scalar_lea.vmem %s999_s25, 128  ;;  %s823_s10 = smov [#allocation10]  }
  0x71   : > { %p730_p5 = scmp.ne.s32.totalorder %s999_s25, %s729_s8  ;;  %s733_s6 = sshll.u32 %s823_s10, 4  ;;  %s734_s6 = int_to_ptr.vmem [resolvable:$false] %s733_s6 }
  0x72   : > { %s735_s22 = scalar_lea.vmem %s734_s6, 256  ;;  %p736_p7 = scmp.lt.s32.totalorder %s999_s25, %s734_s6 }
  0x73   : > { %p731_p12 = pnand %p730_p5, %p904_p9  ;;  %p737_p1 = scmp.lt.s32.totalorder %s735_s22, %s729_s8 }
  0x75   : > { %p732_p6 = pneg %p731_p12  ;;  %p738_p2 = por %p737_p1, %p736_p7 }
  0x77   : > { %p739_p4 = pnand %p738_p2, %p732_p6 }
  0x79   : > { %742 = shalt.err (!%p739_p4)
}
  0x7a   : > { %s743_s14 = scalar_lea.hbm %s1004_s13, 128  ;;  %s747_s1 = scalar_lea.hbm %s1100_s4, 256 }
  0x7b   : > { %p744_p10 = scmp.ne.s32.totalorder %s1004_s13, %s743_s14  ;;  %p748_p3 = scmp.lt.s32.totalorder %s1004_s13, %s1100_s4 }
  0x7c   : > { %p749_p13 = scmp.lt.s32.totalorder %s747_s1, %s743_s14 }
  0x7d   : > { %p745_p8 = pnand %p744_p10, %p904_p9 }
  0x7e   : > { %p750_p5 = por %p749_p13, %p748_p3 }
  0x7f   : > { %p746_p0 = pneg %p745_p8 }
  0x81   : > { %p751_p12 = pnand %p750_p5, %p746_p0 }
  0x83   : > { %754 = shalt.err (!%p751_p12)
}
  0x84   : > { %549 = dma.vmem_to_hbm [thread:$0]  (%p904_p9), %s999_s25, 128, %s1004_s13, %s1006_s12  }
  0x85 PF: > { %s369_s24 = sand.u32 1, %s797_s15   ;;  %p1112_p6 = scmp.ge.s32.totalorder %s817_s20, 2 }
  0x86   : > { %s370_s5 = scalar_lea.sflag [#allocation4], %s369_s24 }
  0x87   : > { %p561_p7 = pnand %p1112_p6, %p913_p11 }
  0x89   : > { %p562_p1 = pneg %p561_p7 }
  0x8b   : > { %788 = dma.done.wait (%p562_p1), %s370_s5, 128  }
  0x8c   : > { %790 = vsyncadd (%p562_p1), %s370_s5, 4294967168  ;;  %s1113_s7 = sadd.s32 4294967294, %s817_s20  }
  0x8d   : > { %s378_s9 = sand.u32 1, %s1113_s7  }
  0x8e   : > { %s379_s28 = scalar_lea.sflag [#allocation9], %s378_s9 }
  0x8f   : > { %792 = dma.done.wait (%p562_p1), %s379_s28, 256  }
  0x90   : > { %794 = vsyncadd (%p562_p1), %s379_s28, 4294967040  ;;  %s27_s20 = sadd.s32 1, %s817_s20   ;;  %s1114_s15 = smov %s801_s16 }
  0x91   : > { %p24_p9 = scmp.ge.s32.totalorder %s27_s20, 4   ;;  %s1115_s16 = smov %s805_s17 }
  0x92   : > { %s1116_s17 = smov %s911_s29  ;;  %s1117_s18 = smov %s813_s19 }
  0x93   : > { %s1118_s19 = smov %s1120_s23  ;;  %26 = sbr.rel (!%p24_p9) target bundleno = 13 (0xd), region = 122 }
  0x98   :  { %393 = vsyncpa [#allocation3], 1 }
  0x99   :  { %395 = vsyncpa [#allocation3 + $0x1], 1 }
  0x9a   :  { %396 = vsyncpa [#allocation6], 1 }
  0x9b   :  { %398 = vsyncpa [#allocation6 + $0x1], 1 }
  0x9c   :  { %399 = vsyncpa [#allocation4], 1 }
  0x9d   :  { %401 = vsyncpa [#allocation4 + $0x1], 1 }
  0x9e   :  { %402 = vsyncpa [#allocation9], 1 }
  0x9f   :  { %404 = vsyncpa [#allocation9 + $0x1], 1 }

</bundles_post_ra>
